<compile_context>
chip_gen: v7x
topology: tpu7x:2x2x1
jax: 0.10.0
libtpu: 0.0.40
codegen_flags: <defaults>
</compile_context>

<pallas_src>
import numpy as np
import jax
import jax.numpy as jnp
from jax import lax
from jax.experimental import pallas as pl
from jax.experimental.pallas import tpu as pltpu


def _round_up(x, m):
    return (x + m - 1) // m * m


def embed_kernel(sent_ref, mask_ref, wemb_ref, base_ref, delta_ref, out_ref):
    """One fused (tile, F_pad) block: cols [0:D] word embed, [D:D+M] mask embed."""
    tile = sent_ref.shape[0]
    V = wemb_ref.shape[0]

    sent = sent_ref[...]                                   # (tile, 1) int32 word ids
    mask_f = mask_ref[...].astype(jnp.float32)             # (tile, 1) in {0., 1.}

    # ---- word embedding: one-hot(sent) @ padded word table on the MXU ------
    # Table is pre-padded in the wrapper to (V, F_pad) with zeros in the mask
    # columns, so the matmul directly produces the word part of the fused row.
    voc_iota = lax.broadcasted_iota(jnp.int32, (tile, V), 1)
    onehot = (voc_iota == sent).astype(jnp.float32)        # (tile, V)
    word_part = jnp.dot(onehot, wemb_ref[...],
                        preferred_element_type=jnp.float32,
                        precision=lax.Precision.HIGHEST)   # exact f32 gather

    # ---- mask embedding: VPU FMA on pre-padded base/delta rows --------------
    # base/delta carry mask_embed[0] / (mask_embed[1]-mask_embed[0]) in columns
    # [D:D+M] and zeros elsewhere, so a single add lands both halves.
    out_ref[...] = word_part + base_ref[...] + mask_f * delta_ref[...]


def _position_weights(mask, power, L):
    """Closed form of the PyTorch proximity-weight loop, plain jnp (tiny op).

    TODO(synk): the PyTorch loop produces a ragged row (and would crash) when
    the target span touches the last token / when a row has no 1s; the closed
    form covers the well-defined (non-ragged) case only.
    """
    mask_i = mask.astype(jnp.int32)
    pos = jnp.arange(L, dtype=jnp.int32)[None, :]
    len_t = jnp.sum(mask_i, axis=1, keepdims=True)
    left = jnp.min(jnp.where(mask_i == 1, pos, L), axis=1, keepdims=True)
    dist = jnp.maximum(jnp.maximum(left - pos, pos - left - len_t), 0)
    base = (100.0 - dist.astype(jnp.float32)) * 0.01
    if float(power).is_integer():
        return lax.integer_pow(base, int(power))            # VPU multiplies
    # Clamp: for dist >= 100 the PyTorch dict lookup would KeyError; avoid NaN.
    return jnp.maximum(base, 0.0) ** power


def simple_cat(sent, mask, word_embed, mask_embed, power, row_tile=1024):
    B, L = sent.shape
    V, D = word_embed.shape
    _, M = mask_embed.shape
    N = B * L
    F = D + M
    F_pad = _round_up(F, 128)

    # Tile: as large as the mem-bound roofline wants (default 1024), but capped
    # so the grid has >= 2 blocks (keeps v7x's second TensorCore busy).
    tile = min(row_tile, max(8, _round_up(max(N // 2, 1), 8)))
    N_pad = _round_up(N, tile)
    grid = (N_pad // tile,)

    # --- wrapper-side layout plumbing (free) ---------------------------------
    # Tail-only pad of the flattened id arrays (no full-size zero + scatter).
    sent_flat = jnp.pad(sent.reshape(N, 1).astype(jnp.int32),
                        ((0, N_pad - N), (0, 0)))
    mask_flat = jnp.pad(mask.reshape(N, 1).astype(jnp.int32),
                        ((0, N_pad - N), (0, 0)))
    # Word table padded into the fused layout: cols [0:D] word, rest zero.
    wemb_p = jnp.pad(word_embed.astype(jnp.float32), ((0, 0), (0, F_pad - D)))
    # Mask table as base/delta rows padded into cols [D:D+M].
    me = mask_embed.astype(jnp.float32)
    base_row = jnp.pad(me[0:1, :], ((0, 0), (D, F_pad - D - M)))
    delta_row = jnp.pad(me[1:2, :] - me[0:1, :], ((0, 0), (D, F_pad - D - M)))

    # --- VMEM accounting with physically padded sizes -------------------------
    LANE, SUB = 128, 8
    vmem_bytes = 4 * (
        2 * 2 * tile * LANE                 # double-buffered sent & mask id blocks (lane-padded)
        + _round_up(V, SUB) * F_pad         # resident fused word table
        + 2 * SUB * F_pad                   # base + delta rows (sublane-padded)
        + 2 * tile * F_pad                  # double-buffered fused output block
        + tile * _round_up(V, LANE)         # in-kernel one-hot temporary (lane-padded)
    )
    try:
        kind = jax.devices()[0].device_kind.lower()
    except Exception:  # pragma: no cover - defensive
        kind = ""
    cap = (48 << 20) if ("v7" in kind or "7x" in kind) else (64 << 20)
    vmem_limit = int(min(max(2 * vmem_bytes, 4 << 20), cap))

    out_fused = pl.pallas_call(
        embed_kernel,
        out_shape=jax.ShapeDtypeStruct((N_pad, F_pad), jnp.float32),
        grid_spec=pltpu.PrefetchScalarGridSpec(
            num_scalar_prefetch=0,
            grid=grid,
            in_specs=[
                pl.BlockSpec((tile, 1), lambda i: (i, 0)),       # word ids
                pl.BlockSpec((tile, 1), lambda i: (i, 0)),       # mask ids
                pl.BlockSpec((V, F_pad), lambda i: (0, 0)),      # fused word table (resident)
                pl.BlockSpec((1, F_pad), lambda i: (0, 0)),      # mask base row (resident)
                pl.BlockSpec((1, F_pad), lambda i: (0, 0)),      # mask delta row (resident)
            ],
            out_specs=pl.BlockSpec((tile, F_pad), lambda i: (i, 0)),
        ),
        compiler_params=pltpu.CompilerParams(
            dimension_semantics=("parallel",),
            vmem_limit_bytes=vmem_limit,
        ),
    )(sent_flat, mask_flat, wemb_p, base_row, delta_row)

    # Un-fuse in the wrapper (layout plumbing, fused into downstream XLA ops).
    sent_vec = out_fused[:N, :D].reshape(B, L, D)
    mask_vec = out_fused[:N, D:D + M].reshape(B, L, M)

    # Position weights: tiny closed-form op, computed in plain jnp (a separate
    # Pallas launch costs more than the compute).
    pos_w = _position_weights(mask, power, L)

    return sent_vec, mask_vec, pos_w


if __name__ == "__main__":
    # config: embed_num=40, embed_dim=32, mask_dim=16, power=2
    B, L = 2, 8
    V, D, M = 40, 32, 16
    power = 2.0

    key = jax.random.PRNGKey(0)
    k_sent, k_w, k_m = jax.random.split(key, 3)

    sent = jax.random.randint(k_sent, (B, L), 0, V, dtype=jnp.int32)
    # target spans (contiguous 1s), not touching the last position
    mask_np = np.zeros((B, L), dtype=np.int32)
    mask_np[0, 2:4] = 1
    mask_np[1, 4:7] = 1
    mask = jnp.asarray(mask_np)

    word_embed = jax.random.normal(k_w, (V, D), dtype=jnp.float32)
    mask_embed = jax.random.normal(k_m, (2, M), dtype=jnp.float32)

    sent_vec, mask_vec, pos_w = jax.block_until_ready(
        simple_cat(sent, mask, word_embed, mask_embed, power))

    # pure-numpy reference
    we = np.asarray(word_embed)
    me = np.asarray(mask_embed)
    s_np = np.asarray(sent)
    ref_sent_vec = we[s_np]                         # (B, L, D)
    ref_mask_vec = me[mask_np]                      # (B, L, M)
    q = np.arange(L)[None, :]
    lt = mask_np.sum(axis=1, keepdims=True)
    left = np.where(mask_np == 1, q, L).min(axis=1, keepdims=True)
    dist = np.maximum(np.maximum(left - q, q - left - lt), 0).astype(np.float32)
    ref_pos_w = ((100.0 - dist) / 100.0) ** power

    np.testing.assert_allclose(np.asarray(sent_vec), ref_sent_vec, rtol=1e-5, atol=1e-5)
    np.testing.assert_allclose(np.asarray(mask_vec), ref_mask_vec, rtol=1e-5, atol=1e-5)
    np.testing.assert_allclose(np.asarray(pos_w), ref_pos_w, rtol=1e-4, atol=1e-5)

    print("KERNEL_OK")
</pallas_src>

<mosaic_0001>
module attributes {stable_mosaic.version = 11 : i64} {
  func.func @embed_kernel(%arg0: i32, %arg1: memref<8x1xi32, #tpu.memory_space<vmem>>, %arg2: memref<8x1xi32, #tpu.memory_space<vmem>>, %arg3: memref<40x128xf32, #tpu.memory_space<vmem>>, %arg4: memref<1x128xf32, #tpu.memory_space<vmem>>, %arg5: memref<1x128xf32, #tpu.memory_space<vmem>>, %arg6: memref<8x128xf32, #tpu.memory_space<vmem>>) attributes {dimension_semantics = [#tpu.dimension_semantics<parallel>], iteration_bounds = array<i64: 2>, scalar_prefetch = 0 : i64, scratch_operands = 0 : i64, tpu.core_type = #tpu.core_type<tc>, window_params = [{transform_indices = @transform_0, window_bounds = array<i64: 8, 1>}, {transform_indices = @transform_1, window_bounds = array<i64: 8, 1>}, {pipeline_mode = #tpu.pipeline_mode<synchronous>, transform_indices = @transform_2, window_bounds = array<i64: 40, 128>}, {pipeline_mode = #tpu.pipeline_mode<synchronous>, transform_indices = @transform_3, window_bounds = array<i64: 1, 128>}, {pipeline_mode = #tpu.pipeline_mode<synchronous>, transform_indices = @transform_4, window_bounds = array<i64: 1, 128>}, {transform_indices = @transform_5, window_bounds = array<i64: 8, 128>}]} {
    %c0 = arith.constant 0 : index
    %c0_0 = arith.constant 0 : index
    %0 = vector.load %arg1[%c0, %c0_0] : memref<8x1xi32, #tpu.memory_space<vmem>>, vector<8x1xi32>
    %c0_1 = arith.constant 0 : index
    %c0_2 = arith.constant 0 : index
    %1 = vector.load %arg2[%c0_1, %c0_2] : memref<8x1xi32, #tpu.memory_space<vmem>>, vector<8x1xi32>
    %2 = arith.sitofp %1 : vector<8x1xi32> to vector<8x1xf32>
    %3 = tpu.iota {dimensions = array<i32: 1>} : vector<8x40xi32>
    %4 = vector.broadcast %0 : vector<8x1xi32> to vector<8x40xi32>
    %5 = arith.cmpi eq, %3, %4 : vector<8x40xi32>
    %6 = arith.extui %5 : vector<8x40xi1> to vector<8x40xi32>
    %7 = arith.sitofp %6 : vector<8x40xi32> to vector<8x40xf32>
    %c0_3 = arith.constant 0 : index
    %c0_4 = arith.constant 0 : index
    %8 = vector.load %arg3[%c0_3, %c0_4] : memref<40x128xf32, #tpu.memory_space<vmem>>, vector<40x128xf32>
    %cst = arith.constant dense<0.000000e+00> : vector<8x128xf32>
    %9 = tpu.matmul %7, %8, %cst {dimension_numbers = #tpu.dot_dimension_numbers<[1], [0], [0], [1], [0, 0, 1, 1], [], []>, precision = #tpu.contract_precision<fp32>} : vector<8x40xf32>, vector<40x128xf32>, vector<8x128xf32> -> vector<8x128xf32>
    %c0_5 = arith.constant 0 : index
    %c0_6 = arith.constant 0 : index
    %10 = vector.load %arg4[%c0_5, %c0_6] : memref<1x128xf32, #tpu.memory_space<vmem>>, vector<1x128xf32>
    %11 = vector.broadcast %10 : vector<1x128xf32> to vector<8x128xf32>
    %12 = arith.addf %9, %11 : vector<8x128xf32>
    %c0_7 = arith.constant 0 : index
    %c0_8 = arith.constant 0 : index
    %13 = vector.load %arg5[%c0_7, %c0_8] : memref<1x128xf32, #tpu.memory_space<vmem>>, vector<1x128xf32>
    %14 = vector.broadcast %2 : vector<8x1xf32> to vector<8x128xf32>
    %15 = vector.broadcast %13 : vector<1x128xf32> to vector<8x128xf32>
    %16 = arith.mulf %14, %15 : vector<8x128xf32>
    %17 = arith.addf %12, %16 : vector<8x128xf32>
    %c0_9 = arith.constant 0 : index
    %c0_10 = arith.constant 0 : index
    %18 = vector.load %arg6[%c0_9, %c0_10] : memref<8x128xf32, #tpu.memory_space<vmem>>, vector<8x128xf32>
    tpu.vector_store %arg6[%c0_9, %c0_10], %17 {strides = array<i32>} : memref<8x128xf32, #tpu.memory_space<vmem>>, vector<8x128xf32>,
    return
  }
  func.func @transform_0(%arg0: i32) -> (i32, i32) {
    %c0_i32 = arith.constant 0 : i32
    %c0_i32_0 = arith.constant 0 : i32
    return %arg0, %c0_i32 : i32, i32
  }
  func.func @transform_1(%arg0: i32) -> (i32, i32) {
    %c0_i32 = arith.constant 0 : i32
    %c0_i32_0 = arith.constant 0 : i32
    return %arg0, %c0_i32 : i32, i32
  }
  func.func @transform_2(%arg0: i32) -> (i32, i32) {
    %c0_i32 = arith.constant 0 : i32
    %c0_i32_0 = arith.constant 0 : i32
    %c0_i32_1 = arith.constant 0 : i32
    return %c0_i32, %c0_i32_0 : i32, i32
  }
  func.func @transform_3(%arg0: i32) -> (i32, i32) {
    %c0_i32 = arith.constant 0 : i32
    %c0_i32_0 = arith.constant 0 : i32
    %c0_i32_1 = arith.constant 0 : i32
    return %c0_i32, %c0_i32_0 : i32, i32
  }
  func.func @transform_4(%arg0: i32) -> (i32, i32) {
    %c0_i32 = arith.constant 0 : i32
    %c0_i32_0 = arith.constant 0 : i32
    %c0_i32_1 = arith.constant 0 : i32
    return %c0_i32, %c0_i32_0 : i32, i32
  }
  func.func @transform_5(%arg0: i32) -> (i32, i32) {
    %c0_i32 = arith.constant 0 : i32
    %c0_i32_0 = arith.constant 0 : i32
    return %arg0, %c0_i32 : i32, i32
  }
}

</mosaic_0001>

<bundles_post_ra>
// kernel: tpu_custom_call.1
= control target key start
LH: loop header
LB: loop body
LE: loop exit
PB: predicated region body
PF: predicated region fallthrough
CT: control target
= control target key end

     0   :  { %10 = vsyncpa [#allocation3], 0  ;;  %s1366_s0 = inlined_call_operand.vmem [shape: s32[16,1], index: 0, kind: input, shape index: {}]   ;;  %s1367_s1 = inlined_call_operand.vmem [shape: s32[16,1], index: 1, kind: input, shape index: {}]   ;;  %s1368_s2 = inlined_call_operand.vmem [shape: f32[40,128], index: 2, kind: input, shape index: {}]   ;;  %s1369_s3 = inlined_call_operand.vmem [shape: f32[1,128], index: 3, kind: input, shape index: {}]   ;;  %s1370_s4 = inlined_call_operand.vmem [shape: f32[1,128], index: 4, kind: input, shape index: {}]   ;;  %s1371_s5 = inlined_call_operand.hbm [shape: f32[16,128], index: 5, kind: output, shape index: {}]  }
   0x1   :  { %12 = vsyncpa [#allocation3 + $0x1], 0  ;;  %s1172_s18 = smov 0   ;;  %s1174_s19 = smov 0  }
   0x2   :  { %s1176_s20 = smov 0   ;;  %s1178_s21 = smov 0  }
   0x3 LB: > { %s1193_s22 = sadd.s32 4294967295, %s1135_s21   ;;  %s862_s23 = sadd.s32 4294967294, %s1135_s21   ;;  %s1135_s21 = sphi %s1178_s21, %s1377_s21   ;;  %s1131_s20 = sphi %s1176_s20, %s1376_s20   ;;  %s1127_s19 = sphi %s1174_s19, %s1375_s19   ;;  %s1123_s18 = sphi %s1172_s18, %s1374_s18  }
   0x4   : > { %s1197_s24 = sadd.s32 1, %s1135_s21   ;;  %s140_s25 = sadd.s32 1, %s1131_s20 }
   0x5   : > { %s137_s26 = ssub.s32 %s1135_s21, %s1197_s24  ;;  %p150_p0 = scmp.ne.s32.totalorder %s1131_s20, %s1127_s19 }
   0x6   : > { %p138_p1 = scmp.eq.s32.totalorder %s137_s26, 0  ;;  %p151_p2 = scmp.eq.s32.totalorder %s1193_s22, 1 }
   0x7   : > { %p156_p3 = scmp.ne.s32.totalorder %s1127_s19, %s1123_s18  ;;  %p157_p4 = scmp.eq.s32.totalorder %s862_s23, 1 }
   0x8   : > { %s1208_s27 = scalar_select %p138_p1, %s1131_s20, %s140_s25  }
   0x9   : > { %p1210_p5 = por %p151_p2, %p150_p0  ;;  %p1214_p6 = por %p157_p4, %p156_p3 }
   0xa   : > { %p865_p7 = scmp.ge.s32.totalorder %s1135_s21, 1  ;;  %p198_p8 = scmp.lt.s32.totalorder %s1135_s21, 3 }
   0xc   : > { %p199_p9 = pnand %p865_p7, %p198_p8 }
   0xd   : > { %p229_p10 = scmp.lt.s32.totalorder (!%p199_p9), %s1193_s22, 1  ;;  %v248_v0 = vld [vmem:[%s1368_s2] sm:$0xff] (!%p199_p9)  ;;  %v249_v1 = vld [vmem:[%s1368_s2 + $0x8] sm:$0xff] (!%p199_p9)  ;;  %v250_v2 = vld [vmem:[%s1368_s2 + $0x10] sm:$0xff] (!%p199_p9)  ;;  %v1137_v3 = vmov (!%p199_p9), 0   ;;  %v1138_v4 = vmov (!%p199_p9), 0.0|0.0   ;;  %v240_v44 = vlaneseq (!%p199_p9) }
   0xe   : > { %202 = sbr.rel (%p199_p9) target bundleno = 417 (0x1a1), region = 40  ;;  %1072 = vset.pattern.permute.xlu0 (!%p199_p9), %v1137_v3  ;;  %999 = vmatprep.subr.bf16.mxu1 (!%p199_p9), %v1138_v4  ;;  %v265_v5 = vand.u32 (!%p199_p9), 4294901760, %v248_v0  ;;  %v268_v6 = vand.u32 (!%p199_p9), 4294901760, %v249_v1  ;;  %v251_v7 = vld [vmem:[%s1368_s2 + $0x18] sm:$0xff] (!%p199_p9)  ;;  %v271_v8 = vand.u32 (!%p199_p9), 4294901760, %v250_v2  ;;  %v252_v9 = vld [vmem:[%s1368_s2 + $0x20] sm:$0xff] (!%p199_p9) }
   0xf   : > { %v274_v10 = vand.u32 (!%p199_p9), 4294901760, %v251_v7  ;;  %993 = vmatprep.subr.bf16.mxu0 (!%p199_p9), %v1138_v4  ;;  %v1239_v11 = vand.u32 (!%p199_p9), 4294901760, %v252_v9  ;;  %vm1139_vm0 = vmmov (!%p199_p9), 0   ;;  %v1140_v33 = vmov (!%p199_p9), 0.0   ;;  %v870_v55 = vld [vmem:[%s1369_s3] ss:$0 sm:$0xff] (!%p199_p9) }
  0x10   : > { %v1241_v12 = vsub.f32 (!%p199_p9), %v248_v0, %v265_v5  ;;  %v1243_v13 = vsub.f32 (!%p199_p9), %v249_v1, %v268_v6  ;;  %v1245_v14 = vsub.f32 (!%p199_p9), %v250_v2, %v271_v8  ;;  %v994_v23 = vpack.c.bf16 (!%p199_p9), %v268_v6, %v265_v5  ;;  %938 = vmatprep.mubr.msk.f32.mxu1 (!%p199_p9), %vm1139_vm0, %v1140_v33  ;;  %s226_s9 = sand.u32 (!%p199_p9), 1, %s1127_s19   ;;  %s876_s13 = sshll.u32 (!%p199_p9), %s1193_s22, 7 }
  0x11   : > { %v1247_v15 = vsub.f32 (!%p199_p9), %v251_v7, %v274_v10  ;;  %v1259_v19 = vsub.f32 (!%p199_p9), %v252_v9, %v1239_v11  ;;  %925 = vmatprep.mubr.msk.f32.mxu0 (!%p199_p9), %vm1139_vm0, %v1140_v33  ;;  %v997_v36 = vpack.c.bf16 (!%p199_p9), %v274_v10, %v271_v8  ;;  %v241_v45 = vand.u32 (!%p199_p9), 127, %v240_v44  ;;  %s866_s10 = sshll.u32 (!%p199_p9), %s226_s9, 3  ;;  %s1324_s23 = scalar_lea.hbm (!%p199_p9), %s1371_s5, %s876_s13 }
  0x12   : > { %v347_v16 = vand.u32 (!%p199_p9), 4294901760, %v1241_v12  ;;  %v354_v17 = vand.u32 (!%p199_p9), 4294901760, %v1243_v13  ;;  %v361_v18 = vand.u32 (!%p199_p9), 4294901760, %v1245_v14  ;;  %995 = vmatpush3.bf16.msra.mxu0 (!%p199_p9), %v994_v23  ;;  %v1006_v40 = vpack.c.bf16 (!%p199_p9), %v1243_v13, %v1241_v12  ;;  %s228_s14 = scalar_lea.vmem (!%p199_p9), [#allocation2], %s866_s10 }
  0x13   : > { %v368_v22 = vand.u32 (!%p199_p9), 4294901760, %v1247_v15  ;;  %v375_v32 = vand.u32 (!%p199_p9), 4294901760, %v1259_v19  ;;  %996 = vmatprep.subr.bf16.mxu0 (!%p199_p9), %v1138_v4  ;;  %v1009_v41 = vpack.c.bf16 (!%p199_p9), %v1247_v15, %v1245_v14  ;;  %vm260_vm1 = vcmask (!%p199_p9), 326656  }
  0x14   : > { %v348_v25 = vsub.f32 (!%p199_p9), %v1241_v12, %v347_v16  ;;  %v355_v26 = vsub.f32 (!%p199_p9), %v1243_v13, %v354_v17  ;;  %v362_v27 = vsub.f32 (!%p199_p9), %v1245_v14, %v361_v18  ;;  %v1018_v42 = vpack.c.bf16 (!%p199_p9), %v354_v17, %v347_v16 }
  0x15   : > { %s230_s15 = scalar_select %p229_p10, %s1193_s22, 1  ;;  %v369_v28 = vsub.f32 %v1247_v15, %v368_v22  ;;  %v376_v38 = vsub.f32 %v1259_v19, %v375_v32  ;;  %v1021_v43 = vpack.c.bf16 %v368_v22, %v361_v18 }
  0x16   : > { %v349_v29 = vand.u32 4294901760, %v348_v25  ;;  %v356_v30 = vand.u32 4294901760, %v355_v26  ;;  %v363_v31 = vand.u32 4294901760, %v362_v27  ;;  %998 = vmatpush3.bf16.msra.mxu0 %v997_v36  ;;  %s1141_s22 = smov [#allocation2]  }
  0x17   : > { %s867_s16 = sshll.u32 %s230_s15, 3  ;;  %v370_v34 = vand.u32 4294901760, %v369_v28  ;;  %923 = vmatprep.subr.mxu0 %v1140_v33  ;;  %v377_v39 = vand.u32 4294901760, %v376_v38  ;;  %s791_s15 = sshll.u32 %s228_s14, 4  ;;  %s1326_s15 = int_to_ptr.vmem [resolvable:$true] %s791_s15 }
  0x18   : > { %s232_s25 = scalar_lea.vmem %s1366_s0, %s867_s16  ;;  %s236_s6 = scalar_lea.vmem %s1367_s1, %s867_s16  ;;  %v1000_v35 = vpack.c.bf16 %v356_v30, %v349_v29 }
  0x19   : > { %v237_v20 = vld [vmem:[%s232_s25] sm:$0xff]  ;;  %v1003_v37 = vpack.c.bf16 %v370_v34, %v363_v31  ;;  %s778_s25 = scalar_lea.sflag [#allocation3], %s226_s9  ;;  %s1073_s26 = scalar_lea.vmem %s1326_s15, 128 }
  0x1a   : > { %v238_v21 = vld [vmem:[%s236_s6] sm:$0xff]  ;;  %243 = vperm.xlu0 %1072, %v237_v20   ;;  %1001 = vmatpush3.bf16.msra.mxu1 %v1000_v35  ;;  %p1074_p11 = scmp.ne.s32.totalorder %s1326_s15, %s1073_s26  ;;  %s1077_s30 = sshll.u32 %s1141_s22, 4  ;;  %s1078_s30 = int_to_ptr.vmem [resolvable:$false] %s1077_s30 }
  0x1b   : > { %v239_v24 = vcvt.s32.f32 %v238_v21  ;;  %1002 = vmatprep.subr.bf16.mxu1 %v1138_v4  ;;  %924 = vmatpush3.msra.mxu0 %v1239_v11  ;;  %s1079_s6 = scalar_lea.vmem %s1078_s30, 256  ;;  %p1080_p0 = scmp.lt.s32.totalorder %s1326_s15, %s1078_s30 }
  0x1c   : > { %1005 = vmatprep.subr.bf16.mxu0 %v1138_v4  ;;  %p1075_p12 = pnand %p1074_p11, %p1210_p5  ;;  %p1081_p1 = scmp.lt.s32.totalorder %s1079_s6, %s1073_s26 }
  0x1e   : > { %765 = vperm.xlu0 %1072, %v239_v24   ;;  %1004 = vmatpush3.bf16.msra.mxu1 %v1003_v37  ;;  %p1076_p13 = pneg %p1075_p12  ;;  %p1082_p2 = por %p1081_p1, %p1080_p0 }
  0x1f   : > { %936 = vmatprep.subr.mxu1 %v1140_v33 }
  0x20   : > { %p1083_p3 = pnand %p1082_p2, %p1076_p13 }
  0x22   : > { %937 = vmatpush3.msra.mxu1 %v377_v39 }
  0x23   : > { %1011 = vmatprep.subr.bf16.mxu1 %v1138_v4 }
  0x99   : > { %v244_v46 = vpop.permute.xlu0 %243 }
  0x9a   : > { %vm245_vm2 = vcmp.eq.s32.totalorder %v241_v45, %v244_v46 }
  0x9b   : > { %v869_v47 = vsel %vm245_vm2, 1.0, %v1140_v33 }
  0x9c   : > { %v262_v48 = vsel %vm260_vm1, %v869_v47, 0  ;;  %939 = vmatmul.mubr.msk.f32.vlgmr.msra.gmra.mrb[0].mxu1 %vm260_vm1, %v869_v47 }
  0x9d   : > { %v335_v49 = vsub.f32 %v262_v48, %v262_v48  ;;  %1013 = vmatpush3.bf16.msra.mxu1 %v994_v23  ;;  %964 = vmatprep.mubr.msk.f32.mxu1 %vm1139_vm0, %v1140_v33  ;;  %v766_v5 = vpop.permute.xlu0 %765 }
  0x9e   : > { %1014 = vmatprep.subr.bf16.mxu1 %v1138_v4 }
  0x9f   : > { %v336_v50 = vand.u32 4294901760, %v335_v49 }
  0xa1   : > { %1016 = vmatpush3.bf16.msra.mxu1 %v997_v36  ;;  %v337_v51 = vsub.f32 %v335_v49, %v336_v50 }
  0xa2   : > { %962 = vmatprep.subr.mxu1 %v1140_v33 }
  0xa3   : > { %v338_v52 = vand.u32 4294901760, %v337_v51 }
  0xa5   : > { %963 = vmatpush3.msra.mxu1 %v1239_v11  ;;  %926 = vmatmul.mubr.f32.vlgmr.msra.gmra.mrb[0].mxu0 %v338_v52 }
  0xa6   : > { %1007 = vmatpush3.bf16.msra.mxu0 %v1006_v40  ;;  %965 = vmatmul.mubr.f32.vlgmr.msra.gmra.mrb[2].mxu1 %v336_v50 }
  0xa7   : > { %1023 = vmatprep.subr.bf16.mxu1 %v1138_v4  ;;  %1008 = vmatprep.subr.bf16.mxu0 %v1138_v4 }
  0xa8   : > { %1025 = vmatpush3.bf16.msra.mxu1 %v994_v23  ;;  %951 = vmatprep.mubr.msk.f32.mxu0 %vm1139_vm0, %v1140_v33 }
  0xa9   : > { %1026 = vmatprep.subr.bf16.mxu1 %v1138_v4  ;;  %990 = vmatprep.mubr.msk.f32.mxu1 %vm1139_vm0, %v1140_v33 }
  0xaa   : > { %1010 = vmatpush3.bf16.msra.mxu0 %v1009_v41 }
  0xab   : > { %949 = vmatprep.subr.mxu0 %v1140_v33 }
  0xac   : > { %1028 = vmatpush3.bf16.msra.mxu1 %v997_v36 }
  0xad   : > { %988 = vmatprep.subr.mxu1 %v1140_v33 }
  0xae   : > { %950 = vmatpush3.msra.mxu0 %v1259_v19 }
  0xaf   : > { %952 = vmatmul.mubr.f32.vlgmr.msra.gmra.mrb[2].mxu0 %v335_v49  ;;  %1017 = vmatprep.subr.bf16.mxu0 %v1138_v4 }
  0xb0   : > { %989 = vmatpush3.msra.mxu1 %v1239_v11  ;;  %1019 = vmatpush3.bf16.msra.mxu0 %v1018_v42 }
  0xb1   : > { %991 = vmatmul.mubr.msk.f32.vlgmr.msra.gmra.mrb[4].mxu1 %vm260_vm1, %v869_v47  ;;  %1020 = vmatprep.subr.bf16.mxu0 %v1138_v4  ;;  %v874_v4 = vld [vmem:[%s1370_s4] ss:$0 sm:$0xff] }
  0xb2   : > { %977 = vmatprep.mubr.msk.f32.mxu0 %vm1139_vm0, %v1140_v33  ;;  %v774_v9 = vmul.f32 %v874_v4, %v766_v5 }
  0xb4   : > { %1022 = vmatpush3.bf16.msra.mxu0 %v1021_v43 }
  0xb5   : > { %975 = vmatprep.subr.mxu0 %v1140_v33 }
  0xb8   : > { %976 = vmatpush3.msra.mxu0 %v375_v32 }
  0xb9   : > { %978 = vmatmul.mubr.msk.f32.vlgmr.msra.gmra.mrb[4].mxu0 %vm260_vm1, %v869_v47 }
 0x16f   : > { %v436_v53 = vpop.f32.mrb[0].mxu1 }
 0x170   : > { %v940_v54 = vpop.f32.mrb[1].mxu1 }
 0x178   : > { %v340_v56 = vpop.f32.mrb[0].mxu0 }
 0x179   : > { %v341_v57 = vadd.f32 %v870_v55, %v340_v56  ;;  %v596_v58 = vpop.f32.mrb[2].mxu1  ;;  %v927_v59 = vpop.f32.mrb[1].mxu0 }
 0x17a   : > { %v966_v60 = vpop.f32.mrb[3].mxu1 }
 0x17b   : > { %v437_v61 = vadd.f32 %v436_v53, %v341_v57 }
 0x182   : > { %v518_v62 = vpop.f32.mrb[2].mxu0 }
 0x183   : > { %v519_v63 = vadd.f32 %v518_v62, %v437_v61  ;;  %v953_v0 = vpop.f32.mrb[3].mxu0 }
 0x184   : > { %v758_v1 = vpop.f32.mrb[4].mxu1 }
 0x185   : > { %v992_v2 = vpop.f32.mrb[5].mxu1  ;;  %v597_v3 = vadd.f32 %v596_v58, %v519_v63 }
 0x18c   : > { %v682_v6 = vpop.f32.mrb[4].mxu0 }
 0x18d   : > { %v683_v7 = vadd.f32 %v682_v6, %v597_v3  ;;  %v979_v8 = vpop.f32.mrb[5].mxu0 }
 0x18f   : > { %v759_v10 = vadd.f32 %v758_v1, %v683_v7 }
 0x191   : > { %v775_v11 = vadd.f32 %v774_v9, %v759_v10 }
 0x193   : > { %776 = vst [vmem:[%s228_s14] sm:$0xff] %v775_v11 }
 0x194   : > { %1086 = shalt.err (!%p1083_p3)
}
 0x195   : > { %s1087_s7 = scalar_lea.hbm %s1324_s23, 128  ;;  %s1091_s10 = scalar_lea.hbm %s1371_s5, 256 }
 0x196   : > { %p1088_p4 = scmp.ne.s32.totalorder %s1324_s23, %s1087_s7  ;;  %p1092_p9 = scmp.lt.u32.totalorder %s1324_s23, %s1371_s5 }
 0x197   : > { %p1093_p10 = scmp.lt.u32.totalorder %s1091_s10, %s1087_s7  ;;  %p1095_p12 = scmp.lt.u32.totalorder %s1087_s7, %s1324_s23 }
 0x198   : > { %p1089_p7 = pnand %p1088_p4, %p1210_p5 }
 0x199   : > { %p1094_p11 = por %p1093_p10, %p1092_p9 }
 0x19a   : > { %p1090_p8 = pneg %p1089_p7 }
 0x19b   : > { %p1096_p13 = por %p1095_p12, %p1094_p11 }
 0x19d   : > { %p1097_p0 = pnand %p1096_p13, %p1090_p8 }
 0x19f   : > { %1100 = shalt.err (!%p1097_p0)
}
 0x1a0   : > { %1029 = dma.vmem_to_hbm [thread:$0]  (%p1210_p5), %s1326_s15, 128, %s1324_s23, %s778_s25  }
 0x1a1 PF: > { %p1035_p1 = scmp.ge.s32.totalorder %s1135_s21, 2  ;;  %s803_s13 = sand.u32 1, %s1123_s18  }
 0x1a2   : > { %s804_s14 = scalar_lea.sflag [#allocation3], %s803_s13 }
 0x1a3   : > { %p1032_p2 = pnand %p1035_p1, %p1214_p6 }
 0x1a5   : > { %1118 = dma.done.wait (!%p1032_p2), %s804_s14, 128  }
 0x1a6   : > { %1120 = vsyncadd (!%p1032_p2), %s804_s14, 4294967168  ;;  %p15_p3 = scmp.ge.s32.totalorder %s1197_s24, 4   ;;  %s1374_s18 = smov %s1127_s19 }
 0x1a7   : > { %s1375_s19 = smov %s1131_s20  ;;  %s1376_s20 = smov %s1208_s27 }
 0x1a8   : > { %s1377_s21 = smov %s1197_s24  ;;  %17 = sbr.rel (!%p15_p3) target bundleno = 3 (0x3), region = 78 }
 0x1af   :  { %809 = vsyncpa [#allocation3], 1 }
 0x1b0   :  { %811 = vsyncpa [#allocation3 + $0x1], 1 }

</bundles_post_ra>
